<compile_context>
chip_gen: v5e
topology: v5e:2x2
jax: 0.10.0
libtpu: 0.0.40
codegen_flags: <defaults>
</compile_context>

<pallas_src>
import jax
import jax.numpy as jnp
from jax.experimental import pallas as pl
from jax.experimental.pallas import tpu as pltpu

H = 768    # encoder hidden size (BERT base)
P = 256    # args['prefix_dim']
L = 2      # num_labels
LP = 128   # lane-dense padded output width (one full vreg lane dim)


def _round_up(x, m):
    return (x + m - 1) // m * m


def ptuning_head_kernel(h_ref, w_ref, b_ref, out_ref):
    # out = hidden @ W_hidden_part^T + (prefix-contribution + ffn bias)
    # (the constant prefix part is pre-folded into b_ref by the wrapper)
    out_ref[...] = (
        jnp.dot(h_ref[...], w_ref[...], preferred_element_type=jnp.float32)
        + b_ref[...]
    ).astype(out_ref.dtype)


def ptuning_forward(hidden, params, *, tm=None):
    B, S, Hh = hidden.shape
    assert Hh == H
    N = B * S

    # ---- prefix sub-network folded to a (1, L) constant (identical per token) ----
    emb = params["emb"].reshape(1, P).astype(jnp.float32)
    prefix = jnp.maximum(emb @ params["wpre"].T.astype(jnp.float32)
                         + params["bpre"].reshape(1, P).astype(jnp.float32), 0.0)  # (1, P)
    bias = (prefix @ params["wffn"][:, :P].T.astype(jnp.float32)
            + params["bffn"].reshape(1, L).astype(jnp.float32))                    # (1, L)

    # ---- lane-dense (padded to 128 lanes) ffn weight / bias ----
    wffn_h = params["wffn"][:, P:].T.astype(hidden.dtype)          # (H, L)
    w_pad = jnp.zeros((H, LP), dtype=hidden.dtype).at[:, :L].set(wffn_h)
    b_pad = jnp.zeros((1, LP), dtype=jnp.float32).at[:, :L].set(bias)

    # ---- row tiling: big tiles, pad N so any B*S works ----
    align = 16 if hidden.dtype == jnp.bfloat16 else 8
    if tm is None:
        tm = min(1024, _round_up(N, align))
    tm = _round_up(tm, align)
    n_pad = _round_up(N, tm)

    h2 = hidden.reshape(N, Hh)
    if n_pad != N:
        h2 = jnp.pad(h2, ((0, n_pad - N), (0, 0)))

    out = pl.pallas_call(
        ptuning_head_kernel,
        out_shape=jax.ShapeDtypeStruct((n_pad, LP), jnp.float32),
        grid_spec=pltpu.PrefetchScalarGridSpec(
            num_scalar_prefetch=0,
            grid=(n_pad // tm,),
            in_specs=[
                pl.BlockSpec((tm, Hh), lambda i: (i, 0)),   # hidden tile
                pl.BlockSpec((Hh, LP), lambda i: (0, 0)),   # ffn hidden-part weight (padded)
                pl.BlockSpec((1, LP),  lambda i: (0, 0)),   # folded prefix contribution + bias
            ],
            out_specs=pl.BlockSpec((tm, LP), lambda i: (i, 0)),
        ),
        compiler_params=pltpu.CompilerParams(
            dimension_semantics=("parallel",)),
    )(h2, w_pad, b_pad)

    # slice off row padding and the zero-padded label lanes BEFORE any downstream use
    return out[:N, :L].reshape(B, S, L)


def reference_forward(hidden, params):
    prefix = jnp.maximum(params["emb"] @ params["wpre"].T + params["bpre"], 0.0)
    B, S, _ = hidden.shape
    prefix = jnp.broadcast_to(prefix, (B, S, P))
    cat = jnp.concatenate([prefix, hidden.astype(jnp.float32)], axis=-1)
    return cat @ params["wffn"].T + params["bffn"]


if __name__ == "__main__":
    key = jax.random.PRNGKey(0)
    k_h, k_e, k_wp, k_bp, k_wf, k_bf = jax.random.split(key, 6)

    B, S = 2, 8
    hidden = jax.random.normal(k_h, (B, S, H), dtype=jnp.float32)  # encoder output

    params = {
        "emb":  jax.random.normal(k_e,  (P,),       dtype=jnp.float32) * 0.02,
        "wpre": jax.random.normal(k_wp, (P, P),     dtype=jnp.float32) * 0.02,
        "bpre": jax.random.normal(k_bp, (P,),       dtype=jnp.float32) * 0.02,
        "wffn": jax.random.normal(k_wf, (L, H + P), dtype=jnp.float32) * 0.02,
        "bffn": jax.random.normal(k_bf, (L,),       dtype=jnp.float32) * 0.02,
    }

    out = ptuning_forward(hidden, params)
    out = jax.block_until_ready(out)

    ref = reference_forward(hidden, params)
    assert out.shape == (B, S, L)
    assert jnp.allclose(out, ref, atol=1e-4, rtol=1e-4)

    print("KERNEL_OK")
</pallas_src>

<mosaic_0001>
module attributes {stable_mosaic.version = 11 : i64} {
  func.func @ptuning_head_kernel(%arg0: i32, %arg1: memref<16x768xf32, #tpu.memory_space<vmem>>, %arg2: memref<768x128xf32, #tpu.memory_space<vmem>>, %arg3: memref<1x128xf32, #tpu.memory_space<vmem>>, %arg4: memref<16x128xf32, #tpu.memory_space<vmem>>) attributes {dimension_semantics = [#tpu.dimension_semantics<parallel>], iteration_bounds = array<i64: 1>, scalar_prefetch = 0 : i64, scratch_operands = 0 : i64, tpu.core_type = #tpu.core_type<tc>, window_params = [{transform_indices = @transform_0, window_bounds = array<i64: 16, 768>}, {pipeline_mode = #tpu.pipeline_mode<synchronous>, transform_indices = @transform_1, window_bounds = array<i64: 768, 128>}, {pipeline_mode = #tpu.pipeline_mode<synchronous>, transform_indices = @transform_2, window_bounds = array<i64: 1, 128>}, {transform_indices = @transform_3, window_bounds = array<i64: 16, 128>}]} {
    %c0 = arith.constant 0 : index
    %c0_0 = arith.constant 0 : index
    %0 = vector.load %arg1[%c0, %c0_0] : memref<16x768xf32, #tpu.memory_space<vmem>>, vector<16x768xf32>
    %c0_1 = arith.constant 0 : index
    %c0_2 = arith.constant 0 : index
    %1 = vector.load %arg2[%c0_1, %c0_2] : memref<768x128xf32, #tpu.memory_space<vmem>>, vector<768x128xf32>
    %cst = arith.constant dense<0.000000e+00> : vector<16x128xf32>
    %2 = tpu.matmul %0, %1, %cst {dimension_numbers = #tpu.dot_dimension_numbers<[1], [0], [0], [1], [0, 0, 1, 1], [], []>} : vector<16x768xf32>, vector<768x128xf32>, vector<16x128xf32> -> vector<16x128xf32>
    %c0_3 = arith.constant 0 : index
    %c0_4 = arith.constant 0 : index
    %3 = vector.load %arg3[%c0_3, %c0_4] : memref<1x128xf32, #tpu.memory_space<vmem>>, vector<1x128xf32>
    %4 = vector.broadcast %3 : vector<1x128xf32> to vector<16x128xf32>
    %5 = arith.addf %2, %4 : vector<16x128xf32>
    %c0_5 = arith.constant 0 : index
    %c0_6 = arith.constant 0 : index
    %6 = vector.load %arg4[%c0_5, %c0_6] : memref<16x128xf32, #tpu.memory_space<vmem>>, vector<16x128xf32>
    tpu.vector_store %arg4[%c0_5, %c0_6], %5 {strides = array<i32>} : memref<16x128xf32, #tpu.memory_space<vmem>>, vector<16x128xf32>,
    return
  }
  func.func @transform_0(%arg0: i32) -> (i32, i32) {
    %c0_i32 = arith.constant 0 : i32
    %c0_i32_0 = arith.constant 0 : i32
    return %arg0, %c0_i32 : i32, i32
  }
  func.func @transform_1(%arg0: i32) -> (i32, i32) {
    %c0_i32 = arith.constant 0 : i32
    %c0_i32_0 = arith.constant 0 : i32
    %c0_i32_1 = arith.constant 0 : i32
    return %c0_i32, %c0_i32_0 : i32, i32
  }
  func.func @transform_2(%arg0: i32) -> (i32, i32) {
    %c0_i32 = arith.constant 0 : i32
    %c0_i32_0 = arith.constant 0 : i32
    %c0_i32_1 = arith.constant 0 : i32
    return %c0_i32, %c0_i32_0 : i32, i32
  }
  func.func @transform_3(%arg0: i32) -> (i32, i32) {
    %c0_i32 = arith.constant 0 : i32
    %c0_i32_0 = arith.constant 0 : i32
    return %arg0, %c0_i32 : i32, i32
  }
}

</mosaic_0001>

<bundles_post_ra>
// kernel: tpu_custom_call.1
= control target key start
LH: loop header
LB: loop body
LE: loop exit
PB: predicated region body
PF: predicated region fallthrough
CT: control target
= control target key end

     0   :  { %8 = vsyncpa [#allocation3], 0  ;;  %s482_s0 = inlined_call_operand.hbm [shape: f32[16,768], index: 0, kind: input, shape index: {}]   ;;  %s483_s1 = inlined_call_operand.hbm [shape: f32[768,128], index: 1, kind: input, shape index: {}]   ;;  %s484_s2 = inlined_call_operand.vmem [shape: f32[1,128], index: 2, kind: input, shape index: {}]   ;;  %s485_s3 = inlined_call_operand.hbm [shape: f32[16,128], index: 3, kind: output, shape index: {}]  }
   0x1   :  { %9 = vsyncpa [#allocation6], 0 }
   0x2   :  { %10 = vsyncpa [#allocation4], 0  ;;  %s15_s14 = sshll.u32 %s482_s0, 4  ;;  %s437_s15 = smov [#allocation2]   ;;  %s16_s14 = int_to_ptr.hbm [resolvable:$true] %s15_s14 }
   0x3   :  { %s17_s16 = sshll.u32 %s437_s15, 4  ;;  %s28_s19 = sshll.u32 %s483_s1, 4  ;;  %s18_s16 = int_to_ptr.vmem [resolvable:$true] %s17_s16  ;;  %s29_s19 = int_to_ptr.hbm [resolvable:$true] %s28_s19 }
   0x4   :  { %s438_s20 = smov 768   ;;  %s439_s21 = smov 48  }
   0x5   :  { %23 = dma.hbm_to_vmem [thread:$0]  %s16_s14, 1536, %s18_s16, [#allocation3], %s438_s20, %s438_s20, %s439_s21  }
   0x6   :  { %s440_s22 = smov [#allocation5]   ;;  %s441_s24 = smov 128  }
   0x7   :  { %s30_s23 = sshll.u32 %s440_s22, 4  ;;  %s442_s25 = smov 8   ;;  %s31_s23 = int_to_ptr.vmem [resolvable:$true] %s30_s23 }
   0x8   :  { %36 = dma.hbm_to_vmem [thread:$0]  %s29_s19, 12288, %s31_s23, [#allocation6], %s441_s24, %s441_s24, %s442_s25  }
   0x9   :  { %431 = dma.done.wait [#allocation3], 1536  }
   0xa   :  { %432 = vsyncadd [#allocation3], 4294965760 }
   0xb   :  { %433 = dma.done.wait [#allocation6], 12288  }
   0xc   :  { %434 = vsyncadd [#allocation6], 4294955008  ;;  %v74_v0 = vld [vmem:[#allocation5 + $0x78] sm:$0xff]  ;;  %v73_v2 = vld [vmem:[#allocation5 + $0x70] sm:$0xff]  ;;  %s305_s29 = sshll.u32 %s485_s3, 4  ;;  %s306_s29 = int_to_ptr.hbm [resolvable:$true] %s305_s29 }
   0xd   :  { %v106_v1 = vld [vmem:[#allocation5 + $0x178] sm:$0xff]  ;;  %159 = vmatpush.msra.mxu0 %v74_v0  ;;  %v105_v4 = vld [vmem:[#allocation5 + $0x170] sm:$0xff]  ;;  %v72_v6 = vld [vmem:[#allocation5 + $0x68] sm:$0xff] }
   0xe   :  { %205 = vmatpush.msra.mxu2 %v106_v1  ;;  %v90_v3 = vld [vmem:[#allocation5 + $0xf8] sm:$0xff]  ;;  %v89_v7 = vld [vmem:[#allocation5 + $0xf0] sm:$0xff]  ;;  %v104_v8 = vld [vmem:[#allocation5 + $0x168] sm:$0xff] }
   0xf   :  { %v122_v5 = vld [vmem:[#allocation5 + $0x1f8] sm:$0xff]  ;;  %182 = vmatpush.msra.mxu1 %v90_v3  ;;  %160 = vmatpush.msra.mxu0 %v73_v2  ;;  %v121_v9 = vld [vmem:[#allocation5 + $0x1f0] sm:$0xff]  ;;  %v88_v10 = vld [vmem:[#allocation5 + $0xe8] sm:$0xff] }
  0x10   :  { %228 = vmatpush.msra.mxu3 %v122_v5  ;;  %206 = vmatpush.msra.mxu2 %v105_v4  ;;  %v71_v11 = vld [vmem:[#allocation5 + $0x60] sm:$0xff]  ;;  %v120_v13 = vld [vmem:[#allocation5 + $0x1e8] sm:$0xff]  ;;  %v70_v16 = vld [vmem:[#allocation5 + $0x58] sm:$0xff] }
  0x11   :  { %183 = vmatpush.msra.mxu1 %v89_v7  ;;  %v103_v12 = vld [vmem:[#allocation5 + $0x160] sm:$0xff]  ;;  %161 = vmatpush.msra.mxu0 %v72_v6  ;;  %v102_v17 = vld [vmem:[#allocation5 + $0x158] sm:$0xff]  ;;  %v69_v20 = vld [vmem:[#allocation5 + $0x50] sm:$0xff] }
  0x12   :  { %229 = vmatpush.msra.mxu3 %v121_v9  ;;  %207 = vmatpush.msra.mxu2 %v104_v8  ;;  %v87_v14 = vld [vmem:[#allocation5 + $0xe0] sm:$0xff]  ;;  %v86_v18 = vld [vmem:[#allocation5 + $0xd8] sm:$0xff]  ;;  %v101_v21 = vld [vmem:[#allocation5 + $0x150] sm:$0xff] }
  0x13   :  { %v119_v15 = vld [vmem:[#allocation5 + $0x1e0] sm:$0xff]  ;;  %184 = vmatpush.msra.mxu1 %v88_v10  ;;  %162 = vmatpush.msra.mxu0 %v71_v11  ;;  %v118_v19 = vld [vmem:[#allocation5 + $0x1d8] sm:$0xff]  ;;  %v85_v22 = vld [vmem:[#allocation5 + $0xd0] sm:$0xff] }
  0x14   :  { %230 = vmatpush.msra.mxu3 %v120_v13  ;;  %208 = vmatpush.msra.mxu2 %v103_v12  ;;  %v117_v23 = vld [vmem:[#allocation5 + $0x1d0] sm:$0xff]  ;;  %v68_v24 = vld [vmem:[#allocation5 + $0x48] sm:$0xff]  ;;  %v67_v28 = vld [vmem:[#allocation5 + $0x40] sm:$0xff] }
  0x15   :  { %185 = vmatpush.msra.mxu1 %v87_v14  ;;  %163 = vmatpush.msra.mxu0 %v70_v16  ;;  %v100_v25 = vld [vmem:[#allocation5 + $0x148] sm:$0xff]  ;;  %v99_v29 = vld [vmem:[#allocation5 + $0x140] sm:$0xff]  ;;  %v66_v32 = vld [vmem:[#allocation5 + $0x38] sm:$0xff] }
  0x16   :  { %231 = vmatpush.msra.mxu3 %v119_v15  ;;  %209 = vmatpush.msra.mxu2 %v102_v17  ;;  %v84_v26 = vld [vmem:[#allocation5 + $0xc8] sm:$0xff]  ;;  %v83_v30 = vld [vmem:[#allocation5 + $0xc0] sm:$0xff]  ;;  %v98_v33 = vld [vmem:[#allocation5 + $0x138] sm:$0xff] }
  0x17   :  { %186 = vmatpush.msra.mxu1 %v86_v18  ;;  %164 = vmatpush.msra.mxu0 %v69_v20  ;;  %v116_v27 = vld [vmem:[#allocation5 + $0x1c8] sm:$0xff]  ;;  %v115_v31 = vld [vmem:[#allocation5 + $0x1c0] sm:$0xff]  ;;  %v82_v34 = vld [vmem:[#allocation5 + $0xb8] sm:$0xff] }
  0x18   :  { %232 = vmatpush.msra.mxu3 %v118_v19  ;;  %210 = vmatpush.msra.mxu2 %v101_v21  ;;  %v114_v35 = vld [vmem:[#allocation5 + $0x1b8] sm:$0xff]  ;;  %v65_v36 = vld [vmem:[#allocation5 + $0x30] sm:$0xff]  ;;  %v64_v40 = vld [vmem:[#allocation5 + $0x28] sm:$0xff] }
  0x19   :  { %187 = vmatpush.msra.mxu1 %v85_v22  ;;  %165 = vmatpush.msra.mxu0 %v68_v24  ;;  %v97_v37 = vld [vmem:[#allocation5 + $0x130] sm:$0xff]  ;;  %v96_v41 = vld [vmem:[#allocation5 + $0x128] sm:$0xff]  ;;  %v63_v44 = vld [vmem:[#allocation5 + $0x20] sm:$0xff] }
  0x1a   :  { %233 = vmatpush.msra.mxu3 %v117_v23  ;;  %211 = vmatpush.msra.mxu2 %v100_v25  ;;  %v81_v38 = vld [vmem:[#allocation5 + $0xb0] sm:$0xff]  ;;  %v80_v42 = vld [vmem:[#allocation5 + $0xa8] sm:$0xff]  ;;  %v95_v45 = vld [vmem:[#allocation5 + $0x120] sm:$0xff] }
  0x1b   :  { %188 = vmatpush.msra.mxu1 %v84_v26  ;;  %166 = vmatpush.msra.mxu0 %v67_v28  ;;  %v113_v39 = vld [vmem:[#allocation5 + $0x1b0] sm:$0xff]  ;;  %v112_v43 = vld [vmem:[#allocation5 + $0x1a8] sm:$0xff]  ;;  %v79_v46 = vld [vmem:[#allocation5 + $0xa0] sm:$0xff] }
  0x1c   :  { %234 = vmatpush.msra.mxu3 %v116_v27  ;;  %212 = vmatpush.msra.mxu2 %v99_v29  ;;  %v111_v47 = vld [vmem:[#allocation5 + $0x1a0] sm:$0xff]  ;;  %v62_v48 = vld [vmem:[#allocation5 + $0x18] sm:$0xff]  ;;  %v61_v52 = vld [vmem:[#allocation5 + $0x10] sm:$0xff] }
  0x1d   :  { %189 = vmatpush.msra.mxu1 %v83_v30  ;;  %167 = vmatpush.msra.mxu0 %v66_v32  ;;  %v94_v49 = vld [vmem:[#allocation5 + $0x118] sm:$0xff]  ;;  %v93_v53 = vld [vmem:[#allocation5 + $0x110] sm:$0xff]  ;;  %v60_v56 = vld [vmem:[#allocation5 + $0x8] sm:$0xff] }
  0x1e   :  { %235 = vmatpush.msra.mxu3 %v115_v31  ;;  %213 = vmatpush.msra.mxu2 %v98_v33  ;;  %v78_v50 = vld [vmem:[#allocation5 + $0x98] sm:$0xff]  ;;  %v77_v54 = vld [vmem:[#allocation5 + $0x90] sm:$0xff]  ;;  %v92_v57 = vld [vmem:[#allocation5 + $0x108] sm:$0xff] }
  0x1f   :  { %190 = vmatpush.msra.mxu1 %v82_v34  ;;  %168 = vmatpush.msra.mxu0 %v65_v36  ;;  %v110_v51 = vld [vmem:[#allocation5 + $0x198] sm:$0xff]  ;;  %v109_v55 = vld [vmem:[#allocation5 + $0x190] sm:$0xff]  ;;  %v76_v58 = vld [vmem:[#allocation5 + $0x88] sm:$0xff] }
  0x20   :  { %236 = vmatpush.msra.mxu3 %v114_v35  ;;  %214 = vmatpush.msra.mxu2 %v97_v37  ;;  %v108_v59 = vld [vmem:[#allocation5 + $0x188] sm:$0xff]  ;;  %v59_v60 = vld [vmem:[#allocation5] sm:$0xff]  ;;  %v138_v62 = vld [vmem:[#allocation5 + $0x278] sm:$0xff] }
  0x21   :  { %191 = vmatpush.msra.mxu1 %v81_v38  ;;  %169 = vmatpush.msra.mxu0 %v64_v40  ;;  %v91_v61 = vld [vmem:[#allocation5 + $0x100] sm:$0xff]  ;;  %v137_v1 = vld [vmem:[#allocation5 + $0x270] sm:$0xff]  ;;  %v154_v2 = vld [vmem:[#allocation5 + $0x2f8] sm:$0xff] }
  0x22   :  { %237 = vmatpush.msra.mxu3 %v113_v39  ;;  %215 = vmatpush.msra.mxu2 %v96_v41  ;;  %v75_v63 = vld [vmem:[#allocation5 + $0x80] sm:$0xff]  ;;  %v136_v3 = vld [vmem:[#allocation5 + $0x268] sm:$0xff]  ;;  %v153_v4 = vld [vmem:[#allocation5 + $0x2f0] sm:$0xff] }
  0x23   :  { %192 = vmatpush.msra.mxu1 %v80_v42  ;;  %170 = vmatpush.msra.mxu0 %v63_v44  ;;  %v107_v0 = vld [vmem:[#allocation5 + $0x180] sm:$0xff]  ;;  %v152_v6 = vld [vmem:[#allocation5 + $0x2e8] sm:$0xff]  ;;  %v134_v7 = vld [vmem:[#allocation5 + $0x258] sm:$0xff] }
  0x24   :  { %238 = vmatpush.msra.mxu3 %v112_v43  ;;  %216 = vmatpush.msra.mxu2 %v95_v45  ;;  %v135_v5 = vld [vmem:[#allocation5 + $0x260] sm:$0xff]  ;;  %v133_v9 = vld [vmem:[#allocation5 + $0x250] sm:$0xff]  ;;  %v150_v10 = vld [vmem:[#allocation5 + $0x2d8] sm:$0xff] }
  0x25   :  { %193 = vmatpush.msra.mxu1 %v79_v46  ;;  %171 = vmatpush.msra.mxu0 %v62_v48  ;;  %v151_v8 = vld [vmem:[#allocation5 + $0x2e0] sm:$0xff]  ;;  %v132_v11 = vld [vmem:[#allocation5 + $0x248] sm:$0xff]  ;;  %v149_v12 = vld [vmem:[#allocation5 + $0x2d0] sm:$0xff] }
  0x26   :  { %239 = vmatpush.msra.mxu3 %v111_v47  ;;  %217 = vmatpush.msra.mxu2 %v94_v49  ;;  %v131_v13 = vld [vmem:[#allocation5 + $0x240] sm:$0xff]  ;;  %v148_v14 = vld [vmem:[#allocation5 + $0x2c8] sm:$0xff]  ;;  %v49_v16 = vld [vmem:[#allocation2 + $0x10] sm:$0xff] }
  0x27   :  { %194 = vmatpush.msra.mxu1 %v78_v50  ;;  %172 = vmatpush.msra.mxu0 %v61_v52  ;;  %v47_v15 = vld [vmem:[#allocation2] sm:$0xff]  ;;  %v130_v17 = vld [vmem:[#allocation5 + $0x238] sm:$0xff]  ;;  %v48_v19 = vld [vmem:[#allocation2 + $0x8] sm:$0xff] }
  0x28   :  { %240 = vmatpush.msra.mxu3 %v110_v51  ;;  %218 = vmatpush.msra.mxu2 %v93_v53  ;;  %v147_v18 = vld [vmem:[#allocation5 + $0x2c0] sm:$0xff]  ;;  %v50_v20 = vld [vmem:[#allocation2 + $0x18] sm:$0xff]  ;;  %v129_v21 = vld [vmem:[#allocation5 + $0x230] sm:$0xff] }
  0x29   :  { %195 = vmatpush.msra.mxu1 %v77_v54  ;;  %173 = vmatpush.msra.mxu0 %v60_v56  ;;  %v146_v22 = vld [vmem:[#allocation5 + $0x2b8] sm:$0xff]  ;;  %v128_v23 = vld [vmem:[#allocation5 + $0x228] sm:$0xff]  ;;  %v145_v24 = vld [vmem:[#allocation5 + $0x2b0] sm:$0xff] }
  0x2a   :  { %241 = vmatpush.msra.mxu3 %v109_v55  ;;  %219 = vmatpush.msra.mxu2 %v92_v57  ;;  %v127_v25 = vld [vmem:[#allocation5 + $0x220] sm:$0xff]  ;;  %v144_v26 = vld [vmem:[#allocation5 + $0x2a8] sm:$0xff]  ;;  %v53_v27 = vld [vmem:[#allocation2 + $0x30] sm:$0xff] }
  0x2b   :  { %196 = vmatpush.msra.mxu1 %v76_v58  ;;  %174 = vmatpush.msra.mxu0 %v59_v60  ;;  %v55_v28 = vld [vmem:[#allocation2 + $0x40] sm:$0xff]  ;;  %v126_v29 = vld [vmem:[#allocation5 + $0x218] sm:$0xff]  ;;  %v56_v32 = vld [vmem:[#allocation2 + $0x48] sm:$0xff] }
  0x2c   :  { %242 = vmatpush.msra.mxu3 %v108_v59  ;;  %220 = vmatpush.msra.mxu2 %v91_v61  ;;  %v143_v30 = vld [vmem:[#allocation5 + $0x2a0] sm:$0xff]  ;;  %v54_v31 = vld [vmem:[#allocation2 + $0x38] sm:$0xff]  ;;  %v125_v33 = vld [vmem:[#allocation5 + $0x210] sm:$0xff] }
  0x2d   :  { %251 = vmatpush.msrb.mxu0 %v138_v62  ;;  %197 = vmatpush.msra.mxu1 %v75_v63  ;;  %v142_v34 = vld [vmem:[#allocation5 + $0x298] sm:$0xff]  ;;  %v124_v35 = vld [vmem:[#allocation5 + $0x208] sm:$0xff]  ;;  %v141_v36 = vld [vmem:[#allocation5 + $0x290] sm:$0xff] }
  0x2e   :  { %319 = vmatpush.msrb.mxu2 %v138_v62  ;;  %243 = vmatpush.msra.mxu3 %v107_v0  ;;  %v123_v37 = vld [vmem:[#allocation5 + $0x200] sm:$0xff]  ;;  %v140_v38 = vld [vmem:[#allocation5 + $0x288] sm:$0xff]  ;;  %v57_v40 = vld [vmem:[#allocation2 + $0x50] sm:$0xff] }
  0x2f   :  { %252 = vmatpush.msrb.mxu0 %v137_v1  ;;  %274 = vmatpush.msrb.mxu1 %v154_v2  ;;  %v51_v39 = vld [vmem:[#allocation2 + $0x20] sm:$0xff]  ;;  %v52_v42 = vld [vmem:[#allocation2 + $0x28] sm:$0xff]  ;;  %v58_v43 = vld [vmem:[#allocation2 + $0x58] sm:$0xff] }
  0x30   :  { %320 = vmatpush.msrb.mxu2 %v137_v1  ;;  %335 = vmatpush.msrb.mxu3 %v154_v2  ;;  %v139_v41 = vld [vmem:[#allocation5 + $0x280] sm:$0xff] }
  0x31   :  { %253 = vmatpush.msrb.mxu0 %v136_v3  ;;  %275 = vmatpush.msrb.mxu1 %v153_v4  ;;  %v358_v45 = vld [vmem:[%s484_s2] ss:$0 sm:$0xff]  ;;  %s443_s2 = smov [#allocation7]  }
  0x32   :  { %321 = vmatpush.msrb.mxu2 %v136_v3  ;;  %336 = vmatpush.msrb.mxu3 %v153_v4  ;;  %s303_s26 = sshll.u32 %s443_s2, 4  ;;  %s304_s26 = int_to_ptr.vmem [resolvable:$true] %s303_s26 }
  0x33   :  { %254 = vmatpush.msrb.mxu0 %v135_v5  ;;  %276 = vmatpush.msrb.mxu1 %v152_v6 }
  0x34   :  { %322 = vmatpush.msrb.mxu2 %v135_v5  ;;  %337 = vmatpush.msrb.mxu3 %v152_v6 }
  0x35   :  { %255 = vmatpush.msrb.mxu0 %v134_v7  ;;  %277 = vmatpush.msrb.mxu1 %v151_v8 }
  0x36   :  { %323 = vmatpush.msrb.mxu2 %v134_v7  ;;  %338 = vmatpush.msrb.mxu3 %v151_v8 }
  0x37   :  { %256 = vmatpush.msrb.mxu0 %v133_v9  ;;  %278 = vmatpush.msrb.mxu1 %v150_v10 }
  0x38   :  { %324 = vmatpush.msrb.mxu2 %v133_v9  ;;  %339 = vmatpush.msrb.mxu3 %v150_v10 }
  0x39   :  { %257 = vmatpush.msrb.mxu0 %v132_v11  ;;  %279 = vmatpush.msrb.mxu1 %v149_v12 }
  0x3a   :  { %325 = vmatpush.msrb.mxu2 %v132_v11  ;;  %340 = vmatpush.msrb.mxu3 %v149_v12 }
  0x3b   :  { %258 = vmatpush.msrb.mxu0 %v131_v13  ;;  %280 = vmatpush.msrb.mxu1 %v148_v14 }
  0x3c   :  { %326 = vmatpush.msrb.mxu2 %v131_v13  ;;  %341 = vmatpush.msrb.mxu3 %v148_v14 }
  0x3d   :  { %175 = vmatmul.f32.vlgmr.msra.gmra.mxu0 %v47_v15  ;;  %221 = vmatmul.f32.vlgmr.msra.gmra.mxu2 %v49_v16 }
  0x3e   :  { %259 = vmatpush.msrb.mxu0 %v130_v17  ;;  %327 = vmatpush.msrb.mxu2 %v130_v17 }
  0x3f   :  { %281 = vmatpush.msrb.mxu1 %v147_v18  ;;  %342 = vmatpush.msrb.mxu3 %v147_v18 }
  0x40   :  { %198 = vmatmul.f32.vlgmr.msra.gmra.mxu1 %v48_v19  ;;  %244 = vmatmul.f32.vlgmr.msra.gmra.mxu3 %v50_v20 }
  0x41   :  { %260 = vmatpush.msrb.mxu0 %v129_v21  ;;  %328 = vmatpush.msrb.mxu2 %v129_v21 }
  0x42   :  { %282 = vmatpush.msrb.mxu1 %v146_v22  ;;  %343 = vmatpush.msrb.mxu3 %v146_v22 }
  0x43   :  { %261 = vmatpush.msrb.mxu0 %v128_v23  ;;  %329 = vmatpush.msrb.mxu2 %v128_v23 }
  0x44   :  { %283 = vmatpush.msrb.mxu1 %v145_v24  ;;  %344 = vmatpush.msrb.mxu3 %v145_v24 }
  0x45   :  { %262 = vmatpush.msrb.mxu0 %v127_v25  ;;  %330 = vmatpush.msrb.mxu2 %v127_v25 }
  0x46   :  { %284 = vmatpush.msrb.mxu1 %v144_v26  ;;  %345 = vmatpush.msrb.mxu3 %v144_v26 }
  0x47   :  { %178 = vmatmul.f32.gmra.mxu0 %v53_v27  ;;  %224 = vmatmul.f32.gmra.mxu2 %v55_v28 }
  0x48   :  { %263 = vmatpush.msrb.mxu0 %v126_v29  ;;  %331 = vmatpush.msrb.mxu2 %v126_v29 }
  0x49   :  { %285 = vmatpush.msrb.mxu1 %v143_v30  ;;  %346 = vmatpush.msrb.mxu3 %v143_v30 }
  0x4a   :  { %201 = vmatmul.f32.gmra.mxu1 %v54_v31  ;;  %247 = vmatmul.f32.gmra.mxu3 %v56_v32 }
  0x4b   :  { %264 = vmatpush.msrb.mxu0 %v125_v33  ;;  %332 = vmatpush.msrb.mxu2 %v125_v33 }
  0x4c   :  { %286 = vmatpush.msrb.mxu1 %v142_v34  ;;  %347 = vmatpush.msrb.mxu3 %v142_v34 }
  0x4d   :  { %265 = vmatpush.msrb.mxu0 %v124_v35  ;;  %333 = vmatpush.msrb.mxu2 %v124_v35 }
  0x4e   :  { %287 = vmatpush.msrb.mxu1 %v141_v36  ;;  %348 = vmatpush.msrb.mxu3 %v141_v36 }
  0x4f   :  { %266 = vmatpush.msrb.mxu0 %v123_v37  ;;  %334 = vmatpush.msrb.mxu2 %v123_v37 }
  0x50   :  { %288 = vmatpush.msrb.mxu1 %v140_v38  ;;  %349 = vmatpush.msrb.mxu3 %v140_v38 }
  0x51   :  { %267 = vmatmul.f32.vlgmr.msrb.gmra.mxu0 %v51_v39  ;;  %270 = vmatmul.f32.vlgmr.msrb.gmra.mxu2 %v57_v40 }
  0x52   :  { %289 = vmatpush.msrb.mxu1 %v139_v41  ;;  %350 = vmatpush.msrb.mxu3 %v139_v41 }
  0x53   :  { %290 = vmatmul.f32.vlgmr.msrb.gmra.mxu1 %v52_v42  ;;  %293 = vmatmul.f32.vlgmr.msrb.gmra.mxu3 %v58_v43 }
  0xba   :  { %v176_v44 = vpop.f32.mrf.mxu0 }
  0xbb   :  { %v177_v48 = vadd.f32 %v358_v45, %v176_v44 }
  0xbd   :  { %v199_v46 = vpop.f32.mrf.mxu1 }
  0xbe   :  { %v200_v51 = vadd.f32 %v199_v46, %v177_v48 }
  0xc0   :  { %v222_v47 = vpop.f32.mrf.mxu2 }
  0xc1   :  { %v223_v54 = vadd.f32 %v222_v47, %v200_v51 }
  0xc3   :  { %v245_v49 = vpop.f32.mrf.mxu3 }
  0xc4   :  { %v179_v50 = vpop.f32.mrf.mxu0  ;;  %v246_v57 = vadd.f32 %v245_v49, %v223_v54 }
  0xc5   :  { %v180_v52 = vadd.f32 %v358_v45, %v179_v50 }
  0xc7   :  { %v202_v53 = vpop.f32.mrf.mxu1 }
  0xc8   :  { %v203_v56 = vadd.f32 %v202_v53, %v180_v52 }
  0xca   :  { %v225_v55 = vpop.f32.mrf.mxu2 }
  0xcb   :  { %v226_v60 = vadd.f32 %v225_v55, %v203_v56 }
  0xcd   :  { %v248_v58 = vpop.f32.mrf.mxu3 }
  0xce   :  { %v268_v59 = vpop.f32.mrf.mxu0  ;;  %v249_v0 = vadd.f32 %v248_v58, %v226_v60 }
  0xcf   :  { %v269_v61 = vadd.f32 %v268_v59, %v246_v57 }
  0xd0   :  { %v291_v62 = vpop.f32.mrf.mxu1 }
  0xd1   :  { %v292_v63 = vadd.f32 %v291_v62, %v269_v61 }
  0xd3   :  { %297 = vst [vmem:[#allocation7] sm:$0xff] %v292_v63 }
  0xd4   :  { %v271_v1 = vpop.f32.mrf.mxu2 }
  0xd5   :  { %v272_v2 = vadd.f32 %v271_v1, %v249_v0 }
  0xd6   :  { %v294_v3 = vpop.f32.mrf.mxu3 }
  0xd7   :  { %v295_v4 = vadd.f32 %v294_v3, %v272_v2 }
  0xd9   :  { %298 = vst [vmem:[#allocation7 + $0x8] sm:$0xff] %v295_v4 }
  0xda   :  { %311 = dma.vmem_to_hbm [thread:$0]  %s304_s26, 256, %s306_s29, [#allocation4], %s441_s24, %s441_s24, %s442_s25  }
  0xdb   :  { %435 = dma.done.wait [#allocation4], 256  }
  0xdc   :  { %436 = vsyncadd [#allocation4], 4294967040 }
  0xdd   :  { %316 = vsyncpa [#allocation3], 1 }
  0xde   :  { %317 = vsyncpa [#allocation6], 1 }
  0xdf   :  { %318 = vsyncpa [#allocation4], 1 }

</bundles_post_ra>
